<compile_context>
chip_gen: v7x
topology: tpu7x:2x2x1
jax: 0.10.0
libtpu: 0.0.40
codegen_flags: <defaults>
</compile_context>

<pallas_src>
import functools

import jax
import jax.numpy as jnp
from jax.experimental import pallas as pl
from jax.experimental.pallas import tpu as pltpu

LANE = 128      # vreg lane width
SUBLANE = 8     # f32 sublanes per vreg


def _round_up(n, m):
    return ((n + m - 1) // m) * m


def _rnn_fused_kernel(x_ref, slab_ref, out_ref, *, ip, hp):
    """x_ref: (Bp, ip) f32, slab_ref: packed weights (rows, hp) f32, out: (Bp, hp).

    Slab row layout (all offsets multiples of 8, all slices width hp=128):
      [0, ip)                       w0   (ip, hp)   = W_ih_l0^T zero-padded
      [ip, ip+8)                    b0   row 0 valid = b_ih_l0 + b_hh_l0
      [ip+8, ip+8+hp)               w1   (hp, hp)   = W_ih_l1^T zero-padded
      [ip+8+hp, ip+16+hp)           b1   row 0 valid = b_ih_l1 + b_hh_l1
      [ip+16+hp, ip+16+2hp)         wfc  (hp, hp)   = W_fc^T zero-padded
      [ip+16+2hp, ip+24+2hp)        bfc  row 0 valid
    """
    r = 0
    w0 = slab_ref[r:r + ip, :]
    r += ip
    b0 = slab_ref[r:r + 1, :]
    r += SUBLANE
    w1 = slab_ref[r:r + hp, :]
    r += hp
    b1 = slab_ref[r:r + 1, :]
    r += SUBLANE
    wfc = slab_ref[r:r + hp, :]
    r += hp
    bfc = slab_ref[r:r + 1, :]

    x = x_ref[...]                                                      # (Bp, ip)
    # Layer 0: relu(x @ W0 + (b_ih0 + b_hh0))        -> (Bp, 128), lane-dense
    h1 = jnp.maximum(
        jnp.dot(x, w0, preferred_element_type=jnp.float32) + b0, 0.0)
    # Layer 1: relu(h1 @ W1 + (b_ih1 + b_hh1))       -> (Bp, 128)
    h2 = jnp.maximum(
        jnp.dot(h1, w1, preferred_element_type=jnp.float32) + b1, 0.0)
    # FC head; output pre-padded to 128 lanes -> dense, unmasked store.
    out_ref[...] = (
        jnp.dot(h2, wfc, preferred_element_type=jnp.float32) + bfc)


@functools.partial(jax.jit, static_argnames=("ip", "hp", "in_size", "out_size"))
def _rnn_forward_jit(slab, x, *, ip, hp, in_size, out_size):
    B = x.shape[0]
    Bp = _round_up(B, SUBLANE)
    # Only per-call host work: zero-pad x to (Bp, ip). Fused into the jit program.
    x_p = jnp.zeros((Bp, ip), jnp.float32).at[:B, :in_size].set(x)

    vmem = pl.BlockSpec(memory_space=pltpu.MemorySpace.VMEM)
    out_p = pl.pallas_call(
        functools.partial(_rnn_fused_kernel, ip=ip, hp=hp),
        out_shape=jax.ShapeDtypeStruct((Bp, hp), jnp.float32),
        in_specs=[vmem, vmem],
        out_specs=vmem,
    )(x_p, slab)
    # Padded batch rows / padded output lanes are garbage/zero; slice them off here
    # (inside the same jit) so callers never see the padded buffer.
    return out_p[:B, :out_size]


def rnn_forward(packed, x, h_state=None):
    """x: (batch, input_size) f32 -> (batch, output_size) f32."""
    if h_state is not None:
        # TODO(synk): nonzero initial hidden state would need the W_hh matmuls; the
        # module's forward defaults to h_state=None (zeros), which is what we fuse.
        raise NotImplementedError("only h_state=None (zeros) is supported")
    return _rnn_forward_jit(
        packed["slab"], x,
        ip=packed["ip"], hp=packed["hp"],
        in_size=packed["in_size"], out_size=packed["out_size"])


def pack_params(params):
    """One-time packing: fold biases, pad to (8,128)-aligned tiles, build one slab."""
    in_size, hidden = params["w_ih_l0_t"].shape
    out_size = params["w_fc_t"].shape[1]

    ip = _round_up(in_size, SUBLANE)                                   # 14 -> 16
    hp = max(_round_up(hidden, LANE), _round_up(out_size, LANE))       # 64/1 -> 128

    b0 = params["b_ih_l0"] + params["b_hh_l0"]   # zero h_state: fold recurrent bias
    b1 = params["b_ih_l1"] + params["b_hh_l1"]

    rows = ip + SUBLANE + hp + SUBLANE + hp + SUBLANE
    slab = jnp.zeros((rows, hp), jnp.float32)
    r = 0
    slab = slab.at[r:r + in_size, :hidden].set(params["w_ih_l0_t"]); r += ip
    slab = slab.at[r, :hidden].set(b0);                               r += SUBLANE
    slab = slab.at[r:r + hidden, :hidden].set(params["w_ih_l1_t"]);   r += hp
    slab = slab.at[r, :hidden].set(b1);                               r += SUBLANE
    slab = slab.at[r:r + hidden, :out_size].set(params["w_fc_t"]);    r += hp
    slab = slab.at[r, :out_size].set(params["b_fc"])

    return {
        "slab": jax.device_put(slab),
        "ip": ip, "hp": hp,
        "in_size": in_size, "out_size": out_size,
    }


def init_params(key, input_size=14, hidden_size=64, output_size=1):
    """PyTorch-style uniform(-1/sqrt(H), 1/sqrt(H)) init; weights stored pre-transposed."""
    ks = jax.random.split(key, 10)
    bound = 1.0 / jnp.sqrt(jnp.float32(hidden_size))
    u = lambda k, shape: jax.random.uniform(k, shape, jnp.float32, -bound, bound)
    return {
        # layer 0 (input -> hidden), stored as (in, out) = W_ih^T
        "w_ih_l0_t": u(ks[0], (input_size, hidden_size)),
        "w_hh_l0_t": u(ks[1], (hidden_size, hidden_size)),   # unused: zero h_state
        "b_ih_l0": u(ks[2], (hidden_size,)),
        "b_hh_l0": u(ks[3], (hidden_size,)),
        # layer 1 (hidden -> hidden)
        "w_ih_l1_t": u(ks[4], (hidden_size, hidden_size)),
        "w_hh_l1_t": u(ks[5], (hidden_size, hidden_size)),   # unused: zero h_state
        "b_ih_l1": u(ks[6], (hidden_size,)),
        "b_hh_l1": u(ks[7], (hidden_size,)),
        # fc head, stored as (hidden, out) = W_fc^T
        "w_fc_t": u(ks[8], (hidden_size, output_size)),
        "b_fc": u(ks[9], (output_size,)),
    }


if __name__ == "__main__":
    key = jax.random.PRNGKey(0)
    k_params, k_x = jax.random.split(key)

    input_size, hidden_size, output_size = 14, 64, 1
    batch = 2

    params = init_params(k_params, input_size, hidden_size, output_size)
    packed = pack_params(params)   # one-time: fold biases, pad, build slab
    x = jax.random.normal(k_x, (batch, input_size), dtype=jnp.float32)

    out = rnn_forward(packed, x)
    jax.block_until_ready(out)
    assert out.shape == (batch, output_size)

    # Pure-JAX reference (same math) to sanity-check the fused kernel.
    h1 = jax.nn.relu(x @ params["w_ih_l0_t"] + params["b_ih_l0"] + params["b_hh_l0"])
    h2 = jax.nn.relu(h1 @ params["w_ih_l1_t"] + params["b_ih_l1"] + params["b_hh_l1"])
    ref = h2 @ params["w_fc_t"] + params["b_fc"]
    assert jnp.allclose(out, ref, atol=1e-5, rtol=1e-5)

    print("KERNEL_OK")
</pallas_src>

<mosaic_0001>
module attributes {stable_mosaic.version = 11 : i64} {
  func.func @_rnn_fused_kernel(%arg0: memref<8x16xf32, #tpu.memory_space<vmem>>, %arg1: memref<296x128xf32, #tpu.memory_space<vmem>>, %arg2: memref<8x128xf32, #tpu.memory_space<vmem>>) attributes {dimension_semantics = [], scalar_prefetch = 0 : i64, scratch_operands = 0 : i64, tpu.core_type = #tpu.core_type<tc>} {
    %c0 = arith.constant 0 : index
    %c0_0 = arith.constant 0 : index
    %0 = vector.load %arg1[%c0, %c0_0] : memref<296x128xf32, #tpu.memory_space<vmem>>, vector<16x128xf32>
    %c16 = arith.constant 16 : index
    %c0_1 = arith.constant 0 : index
    %1 = vector.load %arg1[%c16, %c0_1] : memref<296x128xf32, #tpu.memory_space<vmem>>, vector<1x128xf32>
    %c24 = arith.constant 24 : index
    %c0_2 = arith.constant 0 : index
    %2 = vector.load %arg1[%c24, %c0_2] : memref<296x128xf32, #tpu.memory_space<vmem>>, vector<128x128xf32>
    %c152 = arith.constant 152 : index
    %c0_3 = arith.constant 0 : index
    %3 = vector.load %arg1[%c152, %c0_3] : memref<296x128xf32, #tpu.memory_space<vmem>>, vector<1x128xf32>
    %c160 = arith.constant 160 : index
    %c0_4 = arith.constant 0 : index
    %4 = vector.load %arg1[%c160, %c0_4] : memref<296x128xf32, #tpu.memory_space<vmem>>, vector<128x128xf32>
    %c288 = arith.constant 288 : index
    %c0_5 = arith.constant 0 : index
    %5 = vector.load %arg1[%c288, %c0_5] : memref<296x128xf32, #tpu.memory_space<vmem>>, vector<1x128xf32>
    %c0_6 = arith.constant 0 : index
    %c0_7 = arith.constant 0 : index
    %6 = vector.load %arg0[%c0_6, %c0_7] : memref<8x16xf32, #tpu.memory_space<vmem>>, vector<8x16xf32>
    %cst = arith.constant dense<0.000000e+00> : vector<8x128xf32>
    %7 = tpu.matmul %6, %0, %cst {dimension_numbers = #tpu.dot_dimension_numbers<[1], [0], [0], [1], [0, 0, 1, 1], [], []>} : vector<8x16xf32>, vector<16x128xf32>, vector<8x128xf32> -> vector<8x128xf32>
    %8 = vector.broadcast %1 : vector<1x128xf32> to vector<8x128xf32>
    %9 = arith.addf %7, %8 : vector<8x128xf32>
    %cst_8 = arith.constant 0.000000e+00 : f32
    %10 = vector.broadcast %cst_8 : f32 to vector<8x128xf32>
    %11 = arith.maximumf %9, %10 : vector<8x128xf32>
    %cst_9 = arith.constant dense<0.000000e+00> : vector<8x128xf32>
    %12 = tpu.matmul %11, %2, %cst_9 {dimension_numbers = #tpu.dot_dimension_numbers<[1], [0], [0], [1], [0, 0, 1, 1], [], []>} : vector<8x128xf32>, vector<128x128xf32>, vector<8x128xf32> -> vector<8x128xf32>
    %13 = vector.broadcast %3 : vector<1x128xf32> to vector<8x128xf32>
    %14 = arith.addf %12, %13 : vector<8x128xf32>
    %cst_10 = arith.constant 0.000000e+00 : f32
    %15 = vector.broadcast %cst_10 : f32 to vector<8x128xf32>
    %16 = arith.maximumf %14, %15 : vector<8x128xf32>
    %cst_11 = arith.constant dense<0.000000e+00> : vector<8x128xf32>
    %17 = tpu.matmul %16, %4, %cst_11 {dimension_numbers = #tpu.dot_dimension_numbers<[1], [0], [0], [1], [0, 0, 1, 1], [], []>} : vector<8x128xf32>, vector<128x128xf32>, vector<8x128xf32> -> vector<8x128xf32>
    %18 = vector.broadcast %5 : vector<1x128xf32> to vector<8x128xf32>
    %19 = arith.addf %17, %18 : vector<8x128xf32>
    %c0_12 = arith.constant 0 : index
    %c0_13 = arith.constant 0 : index
    %20 = vector.load %arg2[%c0_12, %c0_13] : memref<8x128xf32, #tpu.memory_space<vmem>>, vector<8x128xf32>
    tpu.vector_store %arg2[%c0_12, %c0_13], %19 {strides = array<i32>} : memref<8x128xf32, #tpu.memory_space<vmem>>, vector<8x128xf32>,
    return
  }
}

</mosaic_0001>

<bundles_post_ra>
// kernel: _rnn_forward_jit.1
= control target key start
LH: loop header
LB: loop body
LE: loop exit
PB: predicated region body
PF: predicated region fallthrough
CT: control target
= control target key end

     0   :  { %7 = vsyncpa [#allocation3], 0  ;;  %s496_s9 = smov [#allocation2]   ;;  %s555_s0 = inlined_call_operand.vmem [shape: f32[8,16], index: 0, kind: input, shape index: {}]   ;;  %s556_s1 = inlined_call_operand.hbm [shape: f32[296,128], index: 1, kind: input, shape index: {}]   ;;  %s557_s2 = inlined_call_operand.vmem [shape: f32[8,128], index: 2, kind: output, shape index: {}]  }
   0x1   :  { %s15_s10 = sshll.u32 %s496_s9, 4  ;;  %s472_s13 = scalar_lea.hbm %s556_s1, 4736  ;;  %s16_s10 = int_to_ptr.vmem [resolvable:$true] %s15_s10 }
   0x2   :  { %p473_p0 = scmp.ne.s32.totalorder %s556_s1, %s472_s13  ;;  %p476_p1 = scmp.lt.u32.totalorder %s472_s13, %s556_s1 }
   0x4   :  { %p478_p2 = pnand %p476_p1, %p473_p0 }
   0x6   :  { %481 = shalt.err (!%p478_p2)
}
   0x7   :  { %s482_s18 = scalar_lea.vmem %s16_s10, 4736  ;;  %p487_p4 = scmp.lt.s32.totalorder %s16_s10, %s16_s10 }
   0x8   :  { %p483_p3 = scmp.ne.s32.totalorder %s16_s10, %s482_s18  ;;  %p488_p5 = scmp.lt.s32.totalorder %s482_s18, %s482_s18 }
   0xa   :  { %p489_p6 = por %p488_p5, %p487_p4 }
   0xc   :  { %p490_p7 = pnand %p489_p6, %p483_p3 }
   0xe   :  { %493 = shalt.err (!%p490_p7)
}
   0xf   :  { %s497_s19 = smov 128   ;;  %s498_s20 = smov 8  }
  0x10   :  { %21 = dma.hbm_to_vmem [thread:$0]  %s556_s1, 4736, %s16_s10, [#allocation3], %s497_s19, %s497_s19, %s498_s20  }
  0x11   :  { %494 = dma.done.wait [#allocation3], 4736  }
  0x12   :  { %495 = vsyncadd [#allocation3], 4294962560  ;;  %v499_v0 = vmov 0.0|0.0   ;;  %vm500_vm0 = vmmov 0   ;;  %v501_v1 = vmov 0.0   ;;  %v25_v2 = vld [vmem:[#allocation2] sm:$0xff] }
  0x13   :  { %415 = vmatprep.subr.bf16.mxu0 %v499_v0  ;;  %342 = vmatprep.mubr.msk.f32.mxu0 %vm500_vm0, %v501_v1  ;;  %v26_v3 = vld [vmem:[#allocation2 + $0x8] sm:$0xff]  ;;  %v28_v5 = vld [vmem:[#allocation2 + $0x18] sm:$0xff]  ;;  %v29_v6 = vld [vmem:[#allocation2 + $0x20] sm:$0xff]  ;;  %vm67_vm1 = vcmask 130048  }
  0x14   :  { %418 = vmatprep.subr.bf16.mxu1 %v499_v0  ;;  %377 = vmatprep.mubr.msk.f32.mxu1 %vm500_vm0, %v501_v1  ;;  %v416_v4 = vpack.c.bf16 %v26_v3, %v25_v2  ;;  %v30_v7 = vld [vmem:[#allocation2 + $0x28] sm:$0xff]  ;;  %v419_v8 = vpack.c.bf16 %v29_v6, %v28_v5  ;;  %v31_v9 = vld [vmem:[#allocation2 + $0x30] sm:$0xff]  ;;  %v62_v10 = vld [vmem:[%s555_s0] sm:$0xff] }
  0x15   :  { %v422_v11 = vpack.c.bf16 %v31_v9, %v30_v7  ;;  %v32_v12 = vld [vmem:[#allocation2 + $0x38] sm:$0xff]  ;;  %v33_v13 = vld [vmem:[#allocation2 + $0x40] sm:$0xff]  ;;  %v34_v15 = vld [vmem:[#allocation2 + $0x48] sm:$0xff] }
  0x16   :  { %417 = vmatpush3.bf16.msra.mxu0 %v416_v4  ;;  %420 = vmatpush3.bf16.msra.mxu1 %v419_v8  ;;  %v425_v14 = vpack.c.bf16 %v33_v13, %v32_v12  ;;  %v35_v16 = vld [vmem:[#allocation2 + $0x50] sm:$0xff]  ;;  %v36_v18 = vld [vmem:[#allocation2 + $0x58] sm:$0xff]  ;;  %v37_v19 = vld [vmem:[#allocation2 + $0x60] sm:$0xff] }
  0x17   :  { %442 = vmatprep.subr.bf16.mxu0 %v499_v0  ;;  %421 = vmatprep.subr.bf16.mxu1 %v499_v0  ;;  %v428_v17 = vpack.c.bf16 %v35_v16, %v34_v15  ;;  %v431_v20 = vpack.c.bf16 %v37_v19, %v36_v18  ;;  %v38_v21 = vld [vmem:[#allocation2 + $0x68] sm:$0xff]  ;;  %v39_v22 = vld [vmem:[#allocation2 + $0x70] sm:$0xff]  ;;  %v40_v24 = vld [vmem:[#allocation2 + $0x78] sm:$0xff] }
  0x18   :  { %v434_v23 = vpack.c.bf16 %v39_v22, %v38_v21  ;;  %v41_v25 = vld [vmem:[#allocation2 + $0x80] sm:$0xff]  ;;  %v42_v27 = vld [vmem:[#allocation2 + $0x88] sm:$0xff]  ;;  %v43_v28 = vld [vmem:[#allocation2 + $0x90] sm:$0xff] }
  0x19   :  { %343 = vmatmul.mubr.msk.f32.vlgmr.msra.gmra.mrb[0].mxu0 %vm67_vm1, %v62_v10  ;;  %v437_v26 = vpack.c.bf16 %v41_v25, %v40_v24  ;;  %v440_v29 = vpack.c.bf16 %v43_v28, %v42_v27  ;;  %v45_v30 = vld [vmem:[#allocation2 + $0xa0] sm:$0xff]  ;;  %v46_v31 = vld [vmem:[#allocation2 + $0xa8] sm:$0xff]  ;;  %v47_v32 = vld [vmem:[#allocation2 + $0xb0] sm:$0xff] }
  0x1a   :  { %412 = vmatprep.mubr.msk.f32.mxu0 %vm500_vm0, %v501_v1  ;;  %423 = vmatpush3.bf16.msra.mxu1 %v422_v11  ;;  %v443_v33 = vpack.c.bf16 %v46_v31, %v45_v30  ;;  %v48_v34 = vld [vmem:[#allocation2 + $0xb8] sm:$0xff]  ;;  %v49_v36 = vld [vmem:[#allocation2 + $0xc0] sm:$0xff]  ;;  %v50_v37 = vld [vmem:[#allocation2 + $0xc8] sm:$0xff] }
  0x1b   :  { %424 = vmatprep.subr.bf16.mxu1 %v499_v0  ;;  %v446_v35 = vpack.c.bf16 %v48_v34, %v47_v32  ;;  %v449_v38 = vpack.c.bf16 %v50_v37, %v49_v36  ;;  %v51_v39 = vld [vmem:[#allocation2 + $0xd0] sm:$0xff]  ;;  %v52_v40 = vld [vmem:[#allocation2 + $0xd8] sm:$0xff]  ;;  %v53_v42 = vld [vmem:[#allocation2 + $0xe0] sm:$0xff] }
  0x1c   :  { %444 = vmatpush3.bf16.msra.mxu0 %v443_v33  ;;  %v452_v41 = vpack.c.bf16 %v52_v40, %v51_v39  ;;  %v54_v43 = vld [vmem:[#allocation2 + $0xe8] sm:$0xff]  ;;  %v55_v45 = vld [vmem:[#allocation2 + $0xf0] sm:$0xff]  ;;  %v56_v46 = vld [vmem:[#allocation2 + $0xf8] sm:$0xff] }
  0x1d   :  { %445 = vmatprep.subr.bf16.mxu0 %v499_v0  ;;  %v455_v44 = vpack.c.bf16 %v54_v43, %v53_v42  ;;  %v458_v47 = vpack.c.bf16 %v56_v46, %v55_v45  ;;  %v57_v48 = vld [vmem:[#allocation2 + $0x100] sm:$0xff]  ;;  %v58_v49 = vld [vmem:[#allocation2 + $0x108] sm:$0xff]  ;;  %v297_v51 = vld [vmem:[#allocation2 + $0x10] ss:$0 sm:$0xff] }
  0x1e   :  { %426 = vmatpush3.bf16.msra.mxu1 %v425_v14  ;;  %v461_v50 = vpack.c.bf16 %v58_v49, %v57_v48  ;;  %v59_v56 = vld [vmem:[#allocation2 + $0x110] sm:$0xff]  ;;  %v60_v57 = vld [vmem:[#allocation2 + $0x118] sm:$0xff]  ;;  %v300_v1 = vld [vmem:[#allocation2 + $0x120] ss:$0 sm:$0xff] }
  0x1f   :  { %427 = vmatprep.subr.bf16.mxu1 %v499_v0  ;;  %v464_v58 = vpack.c.bf16 %v60_v57, %v59_v56  ;;  %v299_v59 = vld [vmem:[#allocation2 + $0x98] ss:$0 sm:$0xff] }
  0x20   :  { %447 = vmatpush3.bf16.msra.mxu0 %v446_v35 }
  0x21   :  { %448 = vmatprep.subr.bf16.mxu0 %v499_v0 }
  0x22   :  { %429 = vmatpush3.bf16.msra.mxu1 %v428_v17 }
  0x23   :  { %430 = vmatprep.subr.bf16.mxu1 %v499_v0 }
  0x24   :  { %450 = vmatpush3.bf16.msra.mxu0 %v449_v38 }
  0x25   :  { %451 = vmatprep.subr.bf16.mxu0 %v499_v0 }
  0x26   :  { %432 = vmatpush3.bf16.msra.mxu1 %v431_v20 }
  0x27   :  { %433 = vmatprep.subr.bf16.mxu1 %v499_v0 }
  0x28   :  { %453 = vmatpush3.bf16.msra.mxu0 %v452_v41 }
  0x29   :  { %454 = vmatprep.subr.bf16.mxu0 %v499_v0 }
  0x2a   :  { %435 = vmatpush3.bf16.msra.mxu1 %v434_v23 }
  0x2b   :  { %436 = vmatprep.subr.bf16.mxu1 %v499_v0 }
  0x2c   :  { %456 = vmatpush3.bf16.msra.mxu0 %v455_v44 }
  0x2d   :  { %457 = vmatprep.subr.bf16.mxu0 %v499_v0 }
  0x2e   :  { %438 = vmatpush3.bf16.msra.mxu1 %v437_v26 }
  0x2f   :  { %439 = vmatprep.subr.bf16.mxu1 %v499_v0 }
  0x30   :  { %459 = vmatpush3.bf16.msra.mxu0 %v458_v47 }
  0x31   :  { %460 = vmatprep.subr.bf16.mxu0 %v499_v0 }
  0x32   :  { %441 = vmatpush3.bf16.msra.mxu1 %v440_v29 }
  0x34   :  { %462 = vmatpush3.bf16.msra.mxu0 %v461_v50 }
  0x35   :  { %463 = vmatprep.subr.bf16.mxu0 %v499_v0 }
  0x38   :  { %465 = vmatpush3.bf16.msra.mxu0 %v464_v58 }
  0xec   :  { %v137_v52 = vpop.f32.mrb[0].mxu0 }
  0xed   :  { %v138_v53 = vadd.f32 %v297_v51, %v137_v52  ;;  %v344_v54 = vpop.f32.mrb[1].mxu0 }
  0xef   :  { %v141_v55 = vmax.f32 %v138_v53, 0.0 }
  0xf1   :  { %378 = vmatmul.mubr.f32.vlgmr.msra.gmra.mrb[0].mxu1 %v141_v55 }
 0x1c4   :  { %v212_v60 = vpop.f32.mrb[0].mxu1 }
 0x1c5   :  { %v213_v61 = vadd.f32 %v299_v59, %v212_v60  ;;  %v379_v62 = vpop.f32.mrb[1].mxu1 }
 0x1c7   :  { %v216_v63 = vmax.f32 %v213_v61, 0.0 }
 0x1c9   :  { %413 = vmatmul.mubr.f32.vlgmr.msra.gmra.mrb[2].mxu0 %v216_v63 }
 0x29c   :  { %v287_v2 = vpop.f32.mrb[2].mxu0 }
 0x29d   :  { %v288_v3 = vadd.f32 %v300_v1, %v287_v2  ;;  %v414_v0 = vpop.f32.mrb[3].mxu0 }
 0x29f   :  { %291 = vst [vmem:[%s557_s2] sm:$0xff] %v288_v3 }
 0x2a0   :  { %296 = vsyncpa [#allocation3], 1 }

</bundles_post_ra>
